<compile_context>
chip_gen: v6e
topology: v6e:2x2x1
jax: 0.10.0
libtpu: 0.0.40
codegen_flags: <defaults>
</compile_context>

<pallas_src>
import jax
import jax.numpy as jnp
from jax.experimental import pallas as pl
from jax.experimental.pallas import tpu as pltpu

K = 13            # conv kernel size
PAD = 6           # conv padding
BN_EPS = 1e-5
OFF = 8           # 8-aligned sublane offset of the data inside staging buffers
TAP0 = OFF - PAD  # staging row read by conv tap k=0 at output position 0


# --------------------------- maxpool-only kernel (default path) ---------------------------
def _make_pool_kernel(L, Lout, NC, std):
    def kernel(x_ref, o_ref, scr_ref):
        # x_ref: (NC, L) f32, o_ref: (NC, Lout) f32, scr_ref: (OFF + L, NC) f32
        scr_ref[OFF - 1:OFF, :] = jnp.full((1, NC), -jnp.inf, jnp.float32)  # left border
        scr_ref[OFF:OFF + L, :] = x_ref[...].T                              # 8-aligned data
        # MaxPool1d(kernel=3, stride=std, padding=1):
        #   pooled[j] = max_k x[std*j + k - 1] -> staging row OFF - 1 + k + std*j
        # (L % std == 0 and std >= 2  =>  the right padding element is never read)
        pooled = scr_ref[pl.ds(OFF - 1, Lout, stride=std), :]
        for k in range(1, 3):
            pooled = jnp.maximum(pooled, scr_ref[pl.ds(OFF - 1 + k, Lout, stride=std), :])
        o_ref[...] = pooled.T                                               # (NC, Lout)
    return kernel


# ----------------------- fused kernel (also computes discarded signal) --------------------
def _make_fused_kernel(L, Lout, Cin, Cout, N, std):
    LP = L + 2 * OFF            # per-batch staging rows; reads span [TAP0, TAP0 + L + 2*PAD - 1]

    def kernel(x_ref, w1_ref, w2_ref, b_ref, pool_ref, sig_ref,
               xpad_ref, a1_ref, act1_ref, a2_ref):
        # x_ref:   (N*Cin, L) f32
        # w1_ref:  (K*Cin, Cout) bf16   (bn1 scale folded in)
        # w2_ref:  (K*Cout, Cout) bf16  (bn2 scale folded in)
        # b_ref:   (2, Cout) f32        (row 0: bn1 bias', row 1: bn2 bias')
        # pool_ref, sig_ref: (N*Cout, Lout) f32
        # scratch: xpad (N*LP, Cin) f32, a1 (N*L, K*Cin) bf16,
        #          act1 (N*LP, Cout) f32, a2 (N*Lout, K*Cout) bf16
        zc_in = jnp.zeros((PAD, Cin), jnp.float32)
        zc_out = jnp.zeros((PAD, Cout), jnp.float32)

        # zero-padded, 8-aligned staging of x^T (zero only the PAD border rows read)
        xT = []
        for n in range(N):
            base = n * LP
            xT_n = x_ref[n * Cin:(n + 1) * Cin, :].T                     # (L, Cin)
            xT.append(xT_n)
            xpad_ref[base + TAP0:base + OFF, :] = zc_in
            xpad_ref[base + OFF + L:base + OFF + L + PAD, :] = zc_in
            xpad_ref[base + OFF:base + OFF + L, :] = xT_n

        # ---- conv1 + bn1 + relu1: one im2col MXU matmul (N*L, K*Cin) @ (K*Cin, Cout) ----
        for n in range(N):
            base = n * LP
            for k in range(K):
                a1_ref[n * L:(n + 1) * L, k * Cin:(k + 1) * Cin] = \
                    xpad_ref[pl.ds(base + TAP0 + k, L), :].astype(jnp.bfloat16)
        y1 = jnp.dot(a1_ref[...], w1_ref[...], preferred_element_type=jnp.float32)
        y1 = jnp.maximum(y1 + b_ref[0:1, :], 0.0)                         # (N*L, Cout) f32

        # ---- conv2 (stride=std) + bn2 + relu2: im2col (N*Lout, K*Cout) @ (K*Cout, Cout) ----
        for n in range(N):
            base = n * LP
            act1_ref[base + TAP0:base + OFF, :] = zc_out
            act1_ref[base + OFF + L:base + OFF + L + PAD, :] = zc_out
            act1_ref[base + OFF:base + OFF + L, :] = y1[n * L:(n + 1) * L, :]
            for k in range(K):
                if std != 1:
                    taps = act1_ref[pl.ds(base + TAP0 + k, Lout, stride=std), :]
                else:
                    taps = act1_ref[pl.ds(base + TAP0 + k, Lout), :]
                a2_ref[n * Lout:(n + 1) * Lout, k * Cout:(k + 1) * Cout] = \
                    taps.astype(jnp.bfloat16)
        y2 = jnp.dot(a2_ref[...], w2_ref[...], preferred_element_type=jnp.float32)
        y2 = jnp.maximum(y2 + b_ref[1:2, :], 0.0)                         # (N*Lout, Cout) f32

        # ---- residual: MaxPool1d(3, stride=std, pad=1) on x, reusing xpad staging ----
        for n in range(N):
            base = n * LP
            if std != 1:
                # the conv zero-padding row at OFF-1 must be -inf for the pool; safe
                # to overwrite now that the conv1 im2col has been built
                xpad_ref[base + OFF - 1:base + OFF, :] = \
                    jnp.full((1, Cin), -jnp.inf, jnp.float32)
                pooled = xpad_ref[pl.ds(base + OFF - 1, Lout, stride=std), :]
                for k in range(1, 3):
                    pooled = jnp.maximum(
                        pooled, xpad_ref[pl.ds(base + OFF - 1 + k, Lout, stride=std), :])
            else:
                pooled = xT[n]                                            # module returns x
            pool_ref[n * Cin:(n + 1) * Cin, :] = pooled.T                 # f32-exact return
            sig_ref[n * Cout:(n + 1) * Cout, :] = \
                (y2[n * Lout:(n + 1) * Lout, :] + pooled).T               # discarded by module

    return kernel


# ----------------------------------------- wrapper ----------------------------------------
def basic_block_apply(x_ncl, kparams, std=2, compute_signal=False):
    """x_ncl: (N, C, L) float32 in PyTorch NCL layout.

    Default: returns only what the PyTorch module returns (x, maxpooled when
    std != 1).  With compute_signal=True, also returns the (discarded)
    conv/bn/relu signal branch: (out_ncl, sig_ncl)."""
    w1i, w2i, b = kparams
    N, Cin, L = x_ncl.shape
    Cout = w1i.shape[-1]
    assert Cin == Cout, "residual add in the reference module requires in_ch == out_ch"
    assert Cin % 8 == 0 and L % 8 == 0, "demo kernel assumes 8-aligned C and L"
    if std != 1:
        assert L % std == 0
    Lout = (L - 1) // std + 1 if std != 1 else L
    x_ncl = x_ncl.astype(jnp.float32)
    NC = N * Cin
    x2d = x_ncl.reshape(NC, L)                       # free reshape (contiguous dims)
    cparams = pltpu.CompilerParams(vmem_limit_bytes=32 * 1024 * 1024)

    if not compute_signal:
        if std == 1:
            return x_ncl                             # module returns x unchanged
        kernel = _make_pool_kernel(L, Lout, NC, std)
        out = pl.pallas_call(
            kernel,
            out_shape=jax.ShapeDtypeStruct((NC, Lout), jnp.float32),
            grid_spec=pltpu.PrefetchScalarGridSpec(
                num_scalar_prefetch=0,
                grid=(1,),
                in_specs=[pl.BlockSpec((NC, L), lambda i: (0, 0))],
                out_specs=pl.BlockSpec((NC, Lout), lambda i: (0, 0)),
                scratch_shapes=[pltpu.VMEM((OFF + L, NC), jnp.float32)],
            ),
            compiler_params=cparams,
        )(x2d)
        return out.reshape(N, Cin, Lout)

    LP = L + 2 * OFF
    kernel = _make_fused_kernel(L, Lout, Cin, Cout, N, std)
    pool2d, sig2d = pl.pallas_call(
        kernel,
        out_shape=(jax.ShapeDtypeStruct((NC, Lout), jnp.float32),
                   jax.ShapeDtypeStruct((N * Cout, Lout), jnp.float32)),
        grid_spec=pltpu.PrefetchScalarGridSpec(
            num_scalar_prefetch=0,
            grid=(1,),
            in_specs=[
                pl.BlockSpec((NC, L), lambda i: (0, 0)),            # x (flattened NCL)
                pl.BlockSpec((K * Cin, Cout), lambda i: (0, 0)),    # w1 im2col, bf16
                pl.BlockSpec((K * Cout, Cout), lambda i: (0, 0)),   # w2 im2col, bf16
                pl.BlockSpec((2, Cout), lambda i: (0, 0)),          # packed bn biases
            ],
            out_specs=(
                pl.BlockSpec((NC, Lout), lambda i: (0, 0)),         # pooled x
                pl.BlockSpec((N * Cout, Lout), lambda i: (0, 0)),   # signal
            ),
            scratch_shapes=[
                pltpu.VMEM((N * LP, Cin), jnp.float32),             # padded x^T staging
                pltpu.VMEM((N * L, K * Cin), jnp.bfloat16),         # conv1 im2col (bf16)
                pltpu.VMEM((N * LP, Cout), jnp.float32),            # padded relu1 staging
                pltpu.VMEM((N * Lout, K * Cout), jnp.bfloat16),     # conv2 im2col (bf16)
            ],
        ),
        compiler_params=cparams,
    )(x2d, w1i, w2i, b)
    return pool2d.reshape(N, Cin, Lout), sig2d.reshape(N, Cout, Lout)


# ---------------- deterministic parameter construction (PyTorch shapes) ----------------
def init_torch_params(key, in_ch, out_ch):
    ks = jax.random.split(key, 10)
    return {
        # nn.Conv1d weight shape: (out_ch, in_ch, kernel_size)
        "w1": 0.1 * jax.random.normal(ks[0], (out_ch, in_ch, K), jnp.float32),
        "w2": 0.1 * jax.random.normal(ks[1], (out_ch, out_ch, K), jnp.float32),
        # BatchNorm1d affine params + running stats (inference mode)
        "g1": 1.0 + 0.1 * jax.random.normal(ks[2], (out_ch,), jnp.float32),
        "be1": 0.1 * jax.random.normal(ks[3], (out_ch,), jnp.float32),
        "rm1": 0.05 * jax.random.normal(ks[4], (out_ch,), jnp.float32),
        "rv1": 1.0 + 0.1 * jnp.abs(jax.random.normal(ks[5], (out_ch,), jnp.float32)),
        "g2": 1.0 + 0.1 * jax.random.normal(ks[6], (out_ch,), jnp.float32),
        "be2": 0.1 * jax.random.normal(ks[7], (out_ch,), jnp.float32),
        "rm2": 0.05 * jax.random.normal(ks[8], (out_ch,), jnp.float32),
        "rv2": 1.0 + 0.1 * jnp.abs(jax.random.normal(ks[9], (out_ch,), jnp.float32)),
    }


def fold_params(p):
    """PyTorch params -> kernel operands: BN scale folded into bf16 im2col weights,
    the two BN biases packed into one (2, Cout) array (glue, not hot path)."""
    s1 = p["g1"] / jnp.sqrt(p["rv1"] + BN_EPS)
    b1 = p["be1"] - p["rm1"] * s1
    s2 = p["g2"] / jnp.sqrt(p["rv2"] + BN_EPS)
    b2 = p["be2"] - p["rm2"] * s2
    w1 = jnp.transpose(p["w1"], (2, 1, 0)) * s1[None, None, :]   # (K, Cin, Cout)
    w2 = jnp.transpose(p["w2"], (2, 1, 0)) * s2[None, None, :]   # (K, Cout, Cout)
    k_, cin, cout = w1.shape
    w1i = w1.reshape(k_ * cin, cout).astype(jnp.bfloat16)        # (K*Cin, Cout)
    w2i = w2.reshape(k_ * w2.shape[1], cout).astype(jnp.bfloat16)
    b = jnp.stack([b1, b2], axis=0)                              # (2, Cout)
    return (w1i, w2i, b)


# ---------------- pure-JAX reference (mirrors the PyTorch forward) ----------------
def reference_forward(x_ncl, p, std):
    dn = ("NCH", "OIH", "NCH")
    hp = jax.lax.Precision.HIGHEST

    def bn(y, g, be, rm, rv):
        return (y - rm[None, :, None]) / jnp.sqrt(rv[None, :, None] + BN_EPS) \
            * g[None, :, None] + be[None, :, None]

    y = jax.lax.conv_general_dilated(x_ncl, p["w1"], (1,), [(PAD, PAD)],
                                     dimension_numbers=dn, precision=hp)
    y = jnp.maximum(bn(y, p["g1"], p["be1"], p["rm1"], p["rv1"]), 0.0)
    y = jax.lax.conv_general_dilated(y, p["w2"], (std,), [(PAD, PAD)],
                                     dimension_numbers=dn, precision=hp)
    y = jnp.maximum(bn(y, p["g2"], p["be2"], p["rm2"], p["rv2"]), 0.0)
    if std != 1:
        xp = jax.lax.reduce_window(x_ncl, -jnp.inf, jax.lax.max,
                                   (1, 1, 3), (1, 1, std),
                                   [(0, 0), (0, 0), (1, 1)])
    else:
        xp = x_ncl
    signal = y + xp
    return xp, signal   # the PyTorch module returns xp (i.e. `x`)


if __name__ == "__main__":
    N, C, L, STD = 2, 8, 32, 2          # in_ch == out_ch (required by `signal + x`)
    key = jax.random.PRNGKey(0)
    kx, kp = jax.random.split(key)
    x = jax.random.normal(kx, (N, C, L), jnp.float32)

    tparams = init_torch_params(kp, C, C)
    kparams = fold_params(tparams)

    # Fast path: exactly what the PyTorch module returns (maxpooled residual).
    out = basic_block_apply(x, kparams, std=STD)
    out = jax.block_until_ready(out)

    # Optional fused path: also materializes the (discarded) signal branch.
    out2, sig = basic_block_apply(x, kparams, std=STD, compute_signal=True)
    out2, sig = jax.block_until_ready((out2, sig))

    ref_out, ref_sig = reference_forward(x, tparams, STD)
    assert out.shape == ref_out.shape and sig.shape == ref_sig.shape
    assert jnp.allclose(out, ref_out, atol=1e-6), "maxpool / residual mismatch (fast path)"
    assert jnp.allclose(out2, ref_out, atol=1e-6), "maxpool / residual mismatch (fused path)"
    assert jnp.allclose(sig, ref_sig, rtol=5e-2, atol=5e-2), "signal branch mismatch"

    print("KERNEL_OK")
</pallas_src>

<mosaic_0001>
module attributes {stable_mosaic.version = 11 : i64} {
  func.func @kernel(%arg0: i32, %arg1: memref<16x32xf32, #tpu.memory_space<vmem>>, %arg2: memref<16x16xf32, #tpu.memory_space<vmem>>, %arg3: memref<40x16xf32, #tpu.memory_space<vmem>>) attributes {dimension_semantics = [#tpu.dimension_semantics<arbitrary>], iteration_bounds = array<i64: 1>, scalar_prefetch = 0 : i64, scratch_operands = 1 : i64, tpu.core_type = #tpu.core_type<tc>, window_params = [{pipeline_mode = #tpu.pipeline_mode<synchronous>, transform_indices = @transform_0, window_bounds = array<i64: 16, 32>}, {pipeline_mode = #tpu.pipeline_mode<synchronous>, transform_indices = @transform_1, window_bounds = array<i64: 16, 16>}]} {
    %cst = arith.constant 0xFF800000 : f32
    %0 = vector.broadcast %cst : f32 to vector<1x16xf32>
    %c7 = arith.constant 7 : index
    %c0 = arith.constant 0 : index
    %1 = vector.load %arg3[%c7, %c0] : memref<40x16xf32, #tpu.memory_space<vmem>>, vector<1x16xf32>
    tpu.vector_store %arg3[%c7, %c0], %0 {strides = array<i32>} : memref<40x16xf32, #tpu.memory_space<vmem>>, vector<1x16xf32>,
    %c0_0 = arith.constant 0 : index
    %c0_1 = arith.constant 0 : index
    %2 = vector.load %arg1[%c0_0, %c0_1] : memref<16x32xf32, #tpu.memory_space<vmem>>, vector<16x32xf32>
    %3 = tpu.transpose %2, [1, 0] : vector<16x32xf32> -> vector<32x16xf32>
    %c8 = arith.constant 8 : index
    %c0_2 = arith.constant 0 : index
    %4 = vector.load %arg3[%c8, %c0_2] : memref<40x16xf32, #tpu.memory_space<vmem>>, vector<32x16xf32>
    tpu.vector_store %arg3[%c8, %c0_2], %3 {strides = array<i32>} : memref<40x16xf32, #tpu.memory_space<vmem>>, vector<32x16xf32>,
    %c7_3 = arith.constant 7 : index
    %c0_4 = arith.constant 0 : index
    %5 = tpu.strided_load %arg3[%c7_3, %c0_4] {strides = array<i32: 2, 1>} : memref<40x16xf32, #tpu.memory_space<vmem>>, vector<16x16xf32>
    %c8_5 = arith.constant 8 : index
    %c0_6 = arith.constant 0 : index
    %6 = tpu.strided_load %arg3[%c8_5, %c0_6] {strides = array<i32: 2, 1>} : memref<40x16xf32, #tpu.memory_space<vmem>>, vector<16x16xf32>
    %7 = arith.maximumf %5, %6 : vector<16x16xf32>
    %c9 = arith.constant 9 : index
    %c0_7 = arith.constant 0 : index
    %8 = tpu.strided_load %arg3[%c9, %c0_7] {strides = array<i32: 2, 1>} : memref<40x16xf32, #tpu.memory_space<vmem>>, vector<16x16xf32>
    %9 = arith.maximumf %7, %8 : vector<16x16xf32>
    %10 = tpu.transpose %9, [1, 0] : vector<16x16xf32> -> vector<16x16xf32>
    %c0_8 = arith.constant 0 : index
    %c0_9 = arith.constant 0 : index
    %11 = vector.load %arg2[%c0_8, %c0_9] : memref<16x16xf32, #tpu.memory_space<vmem>>, vector<16x16xf32>
    tpu.vector_store %arg2[%c0_8, %c0_9], %10 {strides = array<i32>} : memref<16x16xf32, #tpu.memory_space<vmem>>, vector<16x16xf32>,
    return
  }
  func.func @transform_0(%arg0: i32) -> (i32, i32) {
    %c0_i32 = arith.constant 0 : i32
    %c0_i32_0 = arith.constant 0 : i32
    %c0_i32_1 = arith.constant 0 : i32
    return %c0_i32, %c0_i32_0 : i32, i32
  }
  func.func @transform_1(%arg0: i32) -> (i32, i32) {
    %c0_i32 = arith.constant 0 : i32
    %c0_i32_0 = arith.constant 0 : i32
    %c0_i32_1 = arith.constant 0 : i32
    return %c0_i32, %c0_i32_0 : i32, i32
  }
}

</mosaic_0001>

<bundles_post_ra>
// kernel: tpu_custom_call.1
= control target key start
LH: loop header
LB: loop body
LE: loop exit
PB: predicated region body
PF: predicated region fallthrough
CT: control target
= control target key end

     0   :  { %6 = vsyncpa [#allocation4], 0  ;;  %s214_s0 = inlined_call_operand.hbm [shape: f32[16,32], index: 0, kind: input, shape index: {}]   ;;  %s215_s1 = inlined_call_operand.hbm [shape: f32[16,16], index: 1, kind: output, shape index: {}]  }
   0x1   :  { %7 = vsyncpa [#allocation5], 0  ;;  %s181_s6 = smov [#allocation3]  }
   0x2   :  { %s13_s7 = sshll.u32 %s181_s6, 4  ;;  %s14_s7 = int_to_ptr.vmem [resolvable:$true] %s13_s7 }
   0x3   :  { %s145_s8 = scalar_lea.vmem %s14_s7, 256  ;;  %p150_p1 = scmp.lt.s32.totalorder %s14_s7, %s14_s7 }
   0x4   :  { %p146_p0 = scmp.ne.s32.totalorder %s14_s7, %s145_s8  ;;  %p151_p2 = scmp.lt.s32.totalorder %s145_s8, %s145_s8 }
   0x6   :  { %p152_p3 = por %p151_p2, %p150_p1 }
   0x8   :  { %p153_p4 = pnand %p152_p3, %p146_p0 }
   0xa   :  { %156 = shalt.err (!%p153_p4)
}
   0xb   :  { %s182_s9 = smov 128   ;;  %s183_s10 = smov 8  }
   0xc   :  { %19 = dma.hbm_to_vmem [thread:$0]  %s214_s0, 256, %s14_s7, [#allocation4], %s182_s9, %s182_s9, %s183_s10  }
   0xd   :  { %177 = dma.done.wait [#allocation4], 256  }
   0xe   :  { %178 = vsyncadd [#allocation4], 4294967040  ;;  %v25_v0 = vld [vmem:[#allocation3] sm:$0xff]  ;;  %vm23_vm0 = vcmask 122880   ;;  %v26_v1 = vld [vmem:[#allocation3 + $0x8] sm:$0xff]  ;;  %v184_v2 = vmov -inf  }
   0xf   :  { %27 = vxpose.xlu0.b32.start [1/2] (short) (narrow) %v25_v0, 32  ;;  %24 = vst.msk [vmem:[#allocation2 + $0x7] sm:$0x1] %vm23_vm0, %v184_v2  ;;  %vm59_vm1 = vcmask 130048   ;;  %s185_s0 = smov [#allocation6]  }
  0x10   :  { %s119_s13 = sshll.u32 %s185_s0, 4  ;;  %s120_s13 = int_to_ptr.vmem [resolvable:$true] %s119_s13 }
  0x11   :  { %s157_s14 = scalar_lea.vmem %s120_s13, 256  ;;  %p162_p6 = scmp.lt.s32.totalorder %s120_s13, %s120_s13 }
  0x12   :  { %p158_p5 = scmp.ne.s32.totalorder %s120_s13, %s157_s14  ;;  %p163_p7 = scmp.lt.s32.totalorder %s157_s14, %s157_s14 }
  0x13   :  { %28 = vxpose.xlu0.b32.end [2/2] (short) (narrow) %v26_v1, 32 }
  0x14   :  { %p164_p8 = por %p163_p7, %p162_p6 }
  0x16   :  { %p165_p9 = pnand %p164_p8, %p158_p5 }
  0x8b   :  { %v43_v3 = vpop.trf.xlu0 }
  0x8c   :  { %60 = vst.msk [vmem:[#allocation2 + $0x8] sm:$0xff] %vm59_vm1, %v43_v3 }
  0x8f   :  { %v44_v4 = vpop.trf.xlu0 }
  0x90   :  { %61 = vst.msk [vmem:[#allocation2 + $0x10] sm:$0xff] %vm59_vm1, %v44_v4 }
  0x93   :  { %v45_v5 = vpop.trf.xlu0 }
  0x94   :  { %62 = vst.msk [vmem:[#allocation2 + $0x18] sm:$0xff] %vm59_vm1, %v45_v5 }
  0x97   :  { %v46_v6 = vpop.trf.xlu0  ;;  %v65_v7 = vld [vmem:[#allocation2 + $0x7] ss:$2 sm:$0xff]  ;;  %v69_v8 = vld [vmem:[#allocation2 + $0x8] ss:$2 sm:$0xff] }
  0x98   :  { %63 = vst.msk [vmem:[#allocation2 + $0x20] sm:$0xff] %vm59_vm1, %v46_v6  ;;  %v72_v9 = vmax.f32 %v65_v7, %v69_v8  ;;  %v75_v10 = vld [vmem:[#allocation2 + $0x9] ss:$2 sm:$0xff] }
  0x9a   :  { %v78_v11 = vmax.f32 %v72_v9, %v75_v10 }
  0x9c   :  { %80 = vxpose.xlu1.b32.start [1/2] (short) (narrow) %v78_v11, 16 }
  0x9f   :  { %v67_v12 = vld [vmem:[#allocation2 + $0x17] ss:$2 sm:$0xff]  ;;  %v71_v13 = vld [vmem:[#allocation2 + $0x18] ss:$2 sm:$0xff] }
  0xa0   :  { %v73_v14 = vmax.f32 %v67_v12, %v71_v13  ;;  %v77_v15 = vld [vmem:[#allocation2 + $0x19] ss:$2 sm:$0xff] }
  0xa2   :  { %v79_v16 = vmax.f32 %v73_v14, %v77_v15 }
  0xa4   :  { %81 = vxpose.xlu1.b32.end [2/2] (short) (narrow) %v79_v16, 16 }
 0x11c   :  { %v96_v17 = vpop.trf.xlu1 }
 0x11d   :  { %112 = vst.msk [vmem:[#allocation6] sm:$0xff] %vm59_vm1, %v96_v17 }
 0x120   :  { %v97_v18 = vpop.trf.xlu1 }
 0x121   :  { %113 = vst.msk [vmem:[#allocation6 + $0x8] sm:$0xff] %vm59_vm1, %v97_v18 }
 0x122   :  { %168 = shalt.err (!%p165_p9)
}
 0x123   :  { %125 = dma.vmem_to_hbm [thread:$0]  %s120_s13, 256, %s215_s1, [#allocation5], %s182_s9, %s182_s9, %s183_s10  }
 0x124   :  { %179 = dma.done.wait [#allocation5], 256  }
 0x125   :  { %180 = vsyncadd [#allocation5], 4294967040 }
 0x126   :  { %129 = vsyncpa [#allocation4], 1 }
 0x127   :  { %130 = vsyncpa [#allocation5], 1 }

</bundles_post_ra>
